<compile_context>
chip_gen: v5e
topology: v5e:2x2
jax: 0.10.0
libtpu: 0.0.40
codegen_flags: <defaults>
</compile_context>

<pallas_src>
import functools

import jax
import jax.numpy as jnp
from jax.experimental import pallas as pl
from jax.experimental.pallas import tpu as pltpu

_LANE = 128


def _round_up(x, m):
    return ((x + m - 1) // m) * m


def fc3_kernel(x_ref, w1_ref, b1_ref, w2_ref, b2_ref, w3_ref, b3_ref, o_ref):
    # Layer 1: Linear + ReLU. bf16 x bf16 -> f32 accumulation on MXU.
    h1 = jnp.dot(x_ref[...], w1_ref[...], preferred_element_type=jnp.float32)
    h1 = jnp.maximum(h1 + b1_ref[...], 0.0)
    # Layer 2: Linear + ReLU (re-quantize activation to bf16 for the MXU).
    h2 = jnp.dot(h1.astype(w2_ref.dtype), w2_ref[...],
                 preferred_element_type=jnp.float32)
    h2 = jnp.maximum(h2 + b2_ref[...], 0.0)
    # Layer 3: Linear (logits, lane-padded to 128 columns).
    out = jnp.dot(h2.astype(w3_ref.dtype), w3_ref[...],
                  preferred_element_type=jnp.float32)
    o_ref[...] = (out + b3_ref[...]).astype(o_ref.dtype)


def fc3_forward(x, params, *, tm=None):
    """Fused FC3 forward pass.  x: [B, in_dim] float32 -> [B, num_classes] f32."""
    w1, b1, w2, b2, w3, b3 = params
    B, in_dim = x.shape
    h1_dim = w1.shape[1]
    h2_dim = w2.shape[1]
    num_classes = w3.shape[1]

    # --- lane-pad final layer to a dense 128-wide output block -------------
    nc_pad = _round_up(max(num_classes, _LANE), _LANE)
    w3p = jnp.pad(w3, ((0, 0), (0, nc_pad - num_classes)))
    b3p = jnp.pad(b3, ((0, 0), (0, nc_pad - num_classes)))

    # --- batch tiling -------------------------------------------------------
    if tm is None:
        tm = min(512, _round_up(B, 8))          # >=8 sublanes, <=512 rows/tile
    b_pad = _round_up(B, tm)
    if b_pad != B:
        x = jnp.pad(x, ((0, b_pad - B), (0, 0)))
    grid = (b_pad // tm,)

    # --- bf16 casts (weights + activations); biases stay f32 ----------------
    bf = jnp.bfloat16
    xb = x.astype(bf)
    w1b, w2b, w3b = w1.astype(bf), w2.astype(bf), w3p.astype(bf)

    # --- cost estimate (advisory) -------------------------------------------
    flops = 2 * b_pad * (in_dim * h1_dim + h1_dim * h2_dim + h2_dim * nc_pad)
    bytes_accessed = (
        xb.size * 2
        + (w1b.size + w2b.size + w3b.size) * 2
        + (b1.size + b2.size + b3p.size) * 4
        + b_pad * nc_pad * 4
    )

    resident = lambda a: pl.BlockSpec(a.shape, lambda i: (0,) * a.ndim)

    out = pl.pallas_call(
        fc3_kernel,
        out_shape=jax.ShapeDtypeStruct((b_pad, nc_pad), jnp.float32),
        grid=grid,
        in_specs=[
            pl.BlockSpec((tm, in_dim), lambda i: (i, 0)),   # x: tiled over batch
            resident(w1b), resident(b1),                    # weights/biases stay put
            resident(w2b), resident(b2),
            resident(w3b), resident(b3p),
        ],
        out_specs=pl.BlockSpec((tm, nc_pad), lambda i: (i, 0)),
        compiler_params=pltpu.CompilerParams(
            dimension_semantics=("parallel",)),
        cost_estimate=pl.CostEstimate(
            flops=flops, transcendentals=0, bytes_accessed=bytes_accessed),
    )(xb, w1b, b1, w2b, b2, w3b, b3p)

    return out[:B, :num_classes]


def init_params(key, in_dim, num_classes):
    """Deterministic synthetic init (PyTorch-like uniform(-1/sqrt(fan_in), +))."""
    ks = jax.random.split(key, 6)

    def lin(kw, kb, fan_in, fan_out):
        bound = 1.0 / (fan_in ** 0.5)
        w = jax.random.uniform(kw, (fan_in, fan_out), jnp.float32, -bound, bound)
        b = jax.random.uniform(kb, (1, fan_out), jnp.float32, -bound, bound)
        return w, b

    w1, b1 = lin(ks[0], ks[1], in_dim, 256)
    w2, b2 = lin(ks[2], ks[3], 256, 128)
    w3, b3 = lin(ks[4], ks[5], 128, num_classes)
    return (w1, b1, w2, b2, w3, b3)


def fc3_reference_f32(x, params):
    """Pure f32 reference (PyTorch-equivalent math)."""
    w1, b1, w2, b2, w3, b3 = params
    h1 = jnp.maximum(x @ w1 + b1, 0.0)
    h2 = jnp.maximum(h1 @ w2 + b2, 0.0)
    return h2 @ w3 + b3


def fc3_reference_bf16(x, params):
    """Reference mirroring the kernel's bf16-input / f32-accumulate math."""
    w1, b1, w2, b2, w3, b3 = params
    bf = jnp.bfloat16
    h1 = jnp.dot(x.astype(bf), w1.astype(bf), preferred_element_type=jnp.float32)
    h1 = jnp.maximum(h1 + b1, 0.0)
    h2 = jnp.dot(h1.astype(bf), w2.astype(bf), preferred_element_type=jnp.float32)
    h2 = jnp.maximum(h2 + b2, 0.0)
    return jnp.dot(h2.astype(bf), w3.astype(bf),
                   preferred_element_type=jnp.float32) + b3


if __name__ == "__main__":
    # Small shapes consistent with the module: flattened feature vector in,
    # class logits out.
    batch = 8
    in_dim = 512        # in_dim = valid_features[0].numel()
    num_classes = 16    # num_classes = len(set(labels))

    key = jax.random.PRNGKey(0)
    kx, kp = jax.random.split(key)
    x = jax.random.normal(kx, (batch, in_dim), jnp.float32)
    params = init_params(kp, in_dim, num_classes)

    # --- small batch (single grid step) -------------------------------------
    out = jax.block_until_ready(fc3_forward(x, params))
    assert out.shape == (batch, num_classes), out.shape
    ref_bf16 = fc3_reference_bf16(x, params)
    ref_f32 = fc3_reference_f32(x, params)
    assert jnp.allclose(out, ref_bf16, atol=1e-3, rtol=1e-3), \
        "mismatch vs bf16-mirrored reference"
    assert jnp.allclose(out, ref_f32, atol=5e-2, rtol=5e-2), \
        "mismatch vs f32 reference"

    # --- larger batch: exercises batch padding + multi-step grid -----------
    kx2, _ = jax.random.split(kx)
    x_big = jax.random.normal(kx2, (1037, in_dim), jnp.float32)
    out_big = jax.block_until_ready(fc3_forward(x_big, params))
    assert out_big.shape == (1037, num_classes), out_big.shape
    assert jnp.allclose(out_big, fc3_reference_bf16(x_big, params),
                        atol=1e-3, rtol=1e-3), "mismatch (large batch)"

    print("KERNEL_OK")
</pallas_src>

<mosaic_0001>
module attributes {stable_mosaic.version = 11 : i64} {
  func.func @fc3_kernel(%arg0: i32, %arg1: memref<8x512xbf16, #tpu.memory_space<vmem>>, %arg2: memref<512x256xbf16, #tpu.memory_space<vmem>>, %arg3: memref<1x256xf32, #tpu.memory_space<vmem>>, %arg4: memref<256x128xbf16, #tpu.memory_space<vmem>>, %arg5: memref<1x128xf32, #tpu.memory_space<vmem>>, %arg6: memref<128x128xbf16, #tpu.memory_space<vmem>>, %arg7: memref<1x128xf32, #tpu.memory_space<vmem>>, %arg8: memref<8x128xf32, #tpu.memory_space<vmem>>) attributes {dimension_semantics = [#tpu.dimension_semantics<parallel>], iteration_bounds = array<i64: 1>, scalar_prefetch = 0 : i64, scratch_operands = 0 : i64, tpu.core_type = #tpu.core_type<tc>, window_params = [{transform_indices = @transform_0, window_bounds = array<i64: 8, 512>}, {pipeline_mode = #tpu.pipeline_mode<synchronous>, transform_indices = @transform_1, window_bounds = array<i64: 512, 256>}, {pipeline_mode = #tpu.pipeline_mode<synchronous>, transform_indices = @transform_2, window_bounds = array<i64: 1, 256>}, {pipeline_mode = #tpu.pipeline_mode<synchronous>, transform_indices = @transform_3, window_bounds = array<i64: 256, 128>}, {pipeline_mode = #tpu.pipeline_mode<synchronous>, transform_indices = @transform_4, window_bounds = array<i64: 1, 128>}, {pipeline_mode = #tpu.pipeline_mode<synchronous>, transform_indices = @transform_5, window_bounds = array<i64: 128, 128>}, {pipeline_mode = #tpu.pipeline_mode<synchronous>, transform_indices = @transform_6, window_bounds = array<i64: 1, 128>}, {transform_indices = @transform_7, window_bounds = array<i64: 8, 128>}]} {
    %c0 = arith.constant 0 : index
    %c0_0 = arith.constant 0 : index
    %0 = vector.load %arg1[%c0, %c0_0] : memref<8x512xbf16, #tpu.memory_space<vmem>>, vector<8x512xbf16>
    %c0_1 = arith.constant 0 : index
    %c0_2 = arith.constant 0 : index
    %1 = vector.load %arg2[%c0_1, %c0_2] : memref<512x256xbf16, #tpu.memory_space<vmem>>, vector<512x256xbf16>
    %cst = arith.constant dense<0.000000e+00> : vector<8x256xf32>
    %2 = tpu.matmul %0, %1, %cst {dimension_numbers = #tpu.dot_dimension_numbers<[1], [0], [0], [1], [0, 0, 1, 1], [], []>} : vector<8x512xbf16>, vector<512x256xbf16>, vector<8x256xf32> -> vector<8x256xf32>
    %c0_3 = arith.constant 0 : index
    %c0_4 = arith.constant 0 : index
    %3 = vector.load %arg3[%c0_3, %c0_4] : memref<1x256xf32, #tpu.memory_space<vmem>>, vector<1x256xf32>
    %4 = vector.broadcast %3 : vector<1x256xf32> to vector<8x256xf32>
    %5 = arith.addf %2, %4 : vector<8x256xf32>
    %cst_5 = arith.constant 0.000000e+00 : f32
    %6 = vector.broadcast %cst_5 : f32 to vector<8x256xf32>
    %7 = arith.maximumf %5, %6 : vector<8x256xf32>
    %8 = arith.truncf %7 : vector<8x256xf32> to vector<8x256xbf16>
    %c0_6 = arith.constant 0 : index
    %c0_7 = arith.constant 0 : index
    %9 = vector.load %arg4[%c0_6, %c0_7] : memref<256x128xbf16, #tpu.memory_space<vmem>>, vector<256x128xbf16>
    %cst_8 = arith.constant dense<0.000000e+00> : vector<8x128xf32>
    %10 = tpu.matmul %8, %9, %cst_8 {dimension_numbers = #tpu.dot_dimension_numbers<[1], [0], [0], [1], [0, 0, 1, 1], [], []>} : vector<8x256xbf16>, vector<256x128xbf16>, vector<8x128xf32> -> vector<8x128xf32>
    %c0_9 = arith.constant 0 : index
    %c0_10 = arith.constant 0 : index
    %11 = vector.load %arg5[%c0_9, %c0_10] : memref<1x128xf32, #tpu.memory_space<vmem>>, vector<1x128xf32>
    %12 = vector.broadcast %11 : vector<1x128xf32> to vector<8x128xf32>
    %13 = arith.addf %10, %12 : vector<8x128xf32>
    %cst_11 = arith.constant 0.000000e+00 : f32
    %14 = vector.broadcast %cst_11 : f32 to vector<8x128xf32>
    %15 = arith.maximumf %13, %14 : vector<8x128xf32>
    %16 = arith.truncf %15 : vector<8x128xf32> to vector<8x128xbf16>
    %c0_12 = arith.constant 0 : index
    %c0_13 = arith.constant 0 : index
    %17 = vector.load %arg6[%c0_12, %c0_13] : memref<128x128xbf16, #tpu.memory_space<vmem>>, vector<128x128xbf16>
    %cst_14 = arith.constant dense<0.000000e+00> : vector<8x128xf32>
    %18 = tpu.matmul %16, %17, %cst_14 {dimension_numbers = #tpu.dot_dimension_numbers<[1], [0], [0], [1], [0, 0, 1, 1], [], []>} : vector<8x128xbf16>, vector<128x128xbf16>, vector<8x128xf32> -> vector<8x128xf32>
    %c0_15 = arith.constant 0 : index
    %c0_16 = arith.constant 0 : index
    %19 = vector.load %arg7[%c0_15, %c0_16] : memref<1x128xf32, #tpu.memory_space<vmem>>, vector<1x128xf32>
    %20 = vector.broadcast %19 : vector<1x128xf32> to vector<8x128xf32>
    %21 = arith.addf %18, %20 : vector<8x128xf32>
    %c0_17 = arith.constant 0 : index
    %c0_18 = arith.constant 0 : index
    %22 = vector.load %arg8[%c0_17, %c0_18] : memref<8x128xf32, #tpu.memory_space<vmem>>, vector<8x128xf32>
    tpu.vector_store %arg8[%c0_17, %c0_18], %21 {strides = array<i32>} : memref<8x128xf32, #tpu.memory_space<vmem>>, vector<8x128xf32>,
    return
  }
  func.func @transform_0(%arg0: i32) -> (i32, i32) {
    %c0_i32 = arith.constant 0 : i32
    %c0_i32_0 = arith.constant 0 : i32
    return %arg0, %c0_i32 : i32, i32
  }
  func.func @transform_1(%arg0: i32) -> (i32, i32) {
    %c0_i32 = arith.constant 0 : i32
    %c0_i32_0 = arith.constant 0 : i32
    %c0_i32_1 = arith.constant 0 : i32
    return %c0_i32, %c0_i32_0 : i32, i32
  }
  func.func @transform_2(%arg0: i32) -> (i32, i32) {
    %c0_i32 = arith.constant 0 : i32
    %c0_i32_0 = arith.constant 0 : i32
    %c0_i32_1 = arith.constant 0 : i32
    return %c0_i32, %c0_i32_0 : i32, i32
  }
  func.func @transform_3(%arg0: i32) -> (i32, i32) {
    %c0_i32 = arith.constant 0 : i32
    %c0_i32_0 = arith.constant 0 : i32
    %c0_i32_1 = arith.constant 0 : i32
    return %c0_i32, %c0_i32_0 : i32, i32
  }
  func.func @transform_4(%arg0: i32) -> (i32, i32) {
    %c0_i32 = arith.constant 0 : i32
    %c0_i32_0 = arith.constant 0 : i32
    %c0_i32_1 = arith.constant 0 : i32
    return %c0_i32, %c0_i32_0 : i32, i32
  }
  func.func @transform_5(%arg0: i32) -> (i32, i32) {
    %c0_i32 = arith.constant 0 : i32
    %c0_i32_0 = arith.constant 0 : i32
    %c0_i32_1 = arith.constant 0 : i32
    return %c0_i32, %c0_i32_0 : i32, i32
  }
  func.func @transform_6(%arg0: i32) -> (i32, i32) {
    %c0_i32 = arith.constant 0 : i32
    %c0_i32_0 = arith.constant 0 : i32
    %c0_i32_1 = arith.constant 0 : i32
    return %c0_i32, %c0_i32_0 : i32, i32
  }
  func.func @transform_7(%arg0: i32) -> (i32, i32) {
    %c0_i32 = arith.constant 0 : i32
    %c0_i32_0 = arith.constant 0 : i32
    return %arg0, %c0_i32 : i32, i32
  }
}

</mosaic_0001>

<bundles_post_ra>
// kernel: tpu_custom_call.1
= control target key start
LH: loop header
LB: loop body
LE: loop exit
PB: predicated region body
PF: predicated region fallthrough
CT: control target
= control target key end

     0   :  { %12 = vsyncpa [#allocation3], 0  ;;  %s1570_s0 = inlined_call_operand.hbm [shape: bf16[8,512], index: 0, kind: input, shape index: {}]   ;;  %s1571_s1 = inlined_call_operand.hbm [shape: bf16[512,256], index: 1, kind: input, shape index: {}]   ;;  %s1572_s2 = inlined_call_operand.hbm [shape: f32[1,256], index: 2, kind: input, shape index: {}]   ;;  %s1573_s3 = inlined_call_operand.hbm [shape: bf16[256,128], index: 3, kind: input, shape index: {}]   ;;  %s1574_s4 = inlined_call_operand.vmem [shape: f32[1,128], index: 4, kind: input, shape index: {}]   ;;  %s1575_s5 = inlined_call_operand.hbm [shape: bf16[128,128], index: 5, kind: input, shape index: {}]   ;;  %s1576_s6 = inlined_call_operand.vmem [shape: f32[1,128], index: 6, kind: input, shape index: {}]   ;;  %s1577_s7 = inlined_call_operand.hbm [shape: f32[8,128], index: 7, kind: output, shape index: {}]  }
   0x1   :  { %13 = vsyncpa [#allocation6], 0 }
   0x2   :  { %14 = vsyncpa [#allocation9], 0  ;;  %s31_s26 = sshll.u32 %s1571_s1, 4  ;;  %s32_s26 = int_to_ptr.hbm [resolvable:$true] %s31_s26 }
   0x3   :  { %15 = vsyncpa [#allocation4], 0  ;;  %s1480_s27 = smov [#allocation5]   ;;  %s55_s8 = sshll.u32 %s1573_s3, 4  ;;  %s56_s8 = int_to_ptr.hbm [resolvable:$true] %s55_s8 }
   0x4   :  { %s33_s28 = sshll.u32 %s1480_s27, 4  ;;  %s1481_s9 = smov 128   ;;  %s34_s28 = int_to_ptr.vmem [resolvable:$true] %s33_s28 }
   0x5   :  { %s1482_s10 = smov 8   ;;  %s1483_s11 = smov [#allocation8]  }
   0x6   :  { %39 = dma.hbm_to_vmem [thread:$0]  %s32_s26, 8192, %s34_s28, [#allocation6], %s1481_s9, %s1481_s9, %s1482_s10  }
   0x7   :  { %s57_s12 = sshll.u32 %s1483_s11, 4  ;;  %s1484_s13 = smov 64   ;;  %s58_s12 = int_to_ptr.vmem [resolvable:$true] %s57_s12 }
   0x8   :  { %s1485_s14 = smov 4   ;;  %s21_s16 = sshll.u32 %s1570_s0, 4  ;;  %s22_s16 = int_to_ptr.hbm [resolvable:$true] %s21_s16 }
   0x9   :  { %63 = dma.hbm_to_vmem [thread:$0]  %s56_s8, 2048, %s58_s12, [#allocation9], %s1484_s13, %s1484_s13, %s1485_s14  }
   0xa   :  { %s1486_s17 = smov [#allocation2]   ;;  %s45_s20 = sshll.u32 %s1572_s2, 4  ;;  %s46_s20 = int_to_ptr.hbm [resolvable:$true] %s45_s20 }
   0xb   :  { %s23_s18 = sshll.u32 %s1486_s17, 4  ;;  %s1487_s21 = smov [#allocation7]   ;;  %s24_s18 = int_to_ptr.vmem [resolvable:$true] %s23_s18 }
   0xc   :  { %26 = dma.hbm_to_vmem [thread:$0]  %s22_s16, 256, %s24_s18, [#allocation3]  }
   0xd   :  { %s47_s22 = sshll.u32 %s1487_s21, 4  ;;  %s70_s25 = sshll.u32 %s1575_s5, 4  ;;  %s48_s22 = int_to_ptr.vmem [resolvable:$true] %s47_s22  ;;  %s71_s25 = int_to_ptr.hbm [resolvable:$true] %s70_s25 }
   0xe   :  { %50 = dma.hbm_to_vmem [thread:$0]  %s46_s20, 32, %s48_s22, [#allocation6]  }
   0xf   :  { %s1488_s0 = smov [#allocation10]  }
  0x10   :  { %s72_s26 = sshll.u32 %s1488_s0, 4  ;;  %s73_s26 = int_to_ptr.vmem [resolvable:$true] %s72_s26 }
  0x11   :  { %78 = dma.hbm_to_vmem [thread:$0]  %s71_s25, 1024, %s73_s26, [#allocation9], %s1484_s13, %s1484_s13, %s1485_s14  }
  0x12   :  { %1472 = dma.done.wait [#allocation3], 256  }
  0x13   :  { %1473 = vsyncadd [#allocation3], 4294967040 }
  0x14   :  { %1474 = dma.done.wait [#allocation6], 8224  }
  0x15   :  { %1475 = vsyncadd [#allocation6], 4294959072 }
  0x16   :  { %1476 = dma.done.wait [#allocation9], 3072  }
  0x17   :  { %1477 = vsyncadd [#allocation9], 4294964224  ;;  %v934_v0 = vld [vmem:[#allocation5 + $0x70] sm:$0xf]  ;;  %v1243_v1 = vld [vmem:[#allocation5 + $0x74] sm:$0xf0] }
  0x18   :  { %v998_v2 = vld [vmem:[#allocation5 + $0xf0] sm:$0xf]  ;;  %v935_v3 = vor.u32 %v1243_v1, %v934_v0  ;;  %v1259_v4 = vld [vmem:[#allocation5 + $0xf4] sm:$0xf0]  ;;  %v926_v11 = vld [vmem:[#allocation5 + $0x60] sm:$0xf] }
  0x19   :  { %v1062_v5 = vld [vmem:[#allocation5 + $0x170] sm:$0xf]  ;;  %v1275_v6 = vld [vmem:[#allocation5 + $0x174] sm:$0xf0]  ;;  %v999_v7 = vor.u32 %v1259_v4, %v998_v2  ;;  %v1241_v13 = vld [vmem:[#allocation5 + $0x64] sm:$0xf0] }
  0x1a   :  { %v1063_v8 = vor.u32 %v1275_v6, %v1062_v5  ;;  %v1126_v9 = vld [vmem:[#allocation5 + $0x1f0] sm:$0xf]  ;;  %v1291_v10 = vld [vmem:[#allocation5 + $0x1f4] sm:$0xf0]  ;;  %507 = vmatpush.bf16.msra.mxu0 %v935_v3  ;;  %v990_v14 = vld [vmem:[#allocation5 + $0xe0] sm:$0xf]  ;;  %v927_v16 = vor.u32 %v1241_v13, %v926_v11 }
  0x1b   :  { %v1127_v12 = vor.u32 %v1291_v10, %v1126_v9  ;;  %v1257_v15 = vld [vmem:[#allocation5 + $0xe4] sm:$0xf0]  ;;  %520 = vmatpush.bf16.msra.mxu1 %v999_v7  ;;  %v1054_v18 = vld [vmem:[#allocation5 + $0x160] sm:$0xf]  ;;  %v918_v23 = vld [vmem:[#allocation5 + $0x50] sm:$0xf] }
  0x1c   :  { %533 = vmatpush.bf16.msra.mxu2 %v1063_v8  ;;  %v991_v17 = vor.u32 %v1257_v15, %v990_v14  ;;  %v1273_v19 = vld [vmem:[#allocation5 + $0x164] sm:$0xf0]  ;;  %v1118_v20 = vld [vmem:[#allocation5 + $0x1e0] sm:$0xf]  ;;  %v1239_v24 = vld [vmem:[#allocation5 + $0x54] sm:$0xf0] }
  0x1d   :  { %546 = vmatpush.bf16.msra.mxu3 %v1127_v12  ;;  %v1055_v21 = vor.u32 %v1273_v19, %v1054_v18  ;;  %v1289_v22 = vld [vmem:[#allocation5 + $0x1e4] sm:$0xf0]  ;;  %v982_v26 = vld [vmem:[#allocation5 + $0xd0] sm:$0xf]  ;;  %v1255_v27 = vld [vmem:[#allocation5 + $0xd4] sm:$0xf0]  ;;  %v919_v29 = vor.u32 %v1239_v24, %v918_v23 }
  0x1e   :  { %v1119_v25 = vor.u32 %v1289_v22, %v1118_v20  ;;  %v1046_v28 = vld [vmem:[#allocation5 + $0x150] sm:$0xf]  ;;  %508 = vmatpush.bf16.msra.mxu0 %v927_v16  ;;  %v1271_v30 = vld [vmem:[#allocation5 + $0x154] sm:$0xf0]  ;;  %v983_v33 = vor.u32 %v1255_v27, %v982_v26  ;;  %v910_v35 = vld [vmem:[#allocation5 + $0x40] sm:$0xf] }
  0x1f   :  { %v1110_v31 = vld [vmem:[#allocation5 + $0x1d0] sm:$0xf]  ;;  %v1287_v32 = vld [vmem:[#allocation5 + $0x1d4] sm:$0xf0]  ;;  %521 = vmatpush.bf16.msra.mxu1 %v991_v17  ;;  %v1047_v34 = vor.u32 %v1271_v30, %v1046_v28  ;;  %v1237_v36 = vld [vmem:[#allocation5 + $0x44] sm:$0xf0] }
  0x20   :  { %534 = vmatpush.bf16.msra.mxu2 %v1055_v21  ;;  %v974_v37 = vld [vmem:[#allocation5 + $0xc0] sm:$0xf]  ;;  %v1111_v38 = vor.u32 %v1287_v32, %v1110_v31  ;;  %v1253_v39 = vld [vmem:[#allocation5 + $0xc4] sm:$0xf0]  ;;  %v911_v44 = vor.u32 %v1237_v36, %v910_v35  ;;  %v902_v47 = vld [vmem:[#allocation5 + $0x30] sm:$0xf] }
  0x21   :  { %547 = vmatpush.bf16.msra.mxu3 %v1119_v25  ;;  %v1038_v40 = vld [vmem:[#allocation5 + $0x140] sm:$0xf]  ;;  %v1269_v41 = vld [vmem:[#allocation5 + $0x144] sm:$0xf0]  ;;  %v975_v45 = vor.u32 %v1253_v39, %v974_v37  ;;  %v1235_v48 = vld [vmem:[#allocation5 + $0x34] sm:$0xf0] }
  0x22   :  { %v1102_v42 = vld [vmem:[#allocation5 + $0x1c0] sm:$0xf]  ;;  %v1285_v43 = vld [vmem:[#allocation5 + $0x1c4] sm:$0xf0]  ;;  %509 = vmatpush.bf16.msra.mxu0 %v919_v29  ;;  %v1039_v46 = vor.u32 %v1269_v41, %v1038_v40  ;;  %v966_v49 = vld [vmem:[#allocation5 + $0xb0] sm:$0xf]  ;;  %v903_v56 = vor.u32 %v1235_v48, %v902_v47 }
  0x23   :  { %522 = vmatpush.bf16.msra.mxu1 %v983_v33  ;;  %v1103_v50 = vor.u32 %v1285_v43, %v1102_v42  ;;  %v1251_v51 = vld [vmem:[#allocation5 + $0xb4] sm:$0xf0]  ;;  %v1030_v52 = vld [vmem:[#allocation5 + $0x130] sm:$0xf]  ;;  %v894_v59 = vld [vmem:[#allocation5 + $0x20] sm:$0xf] }
  0x24   :  { %535 = vmatpush.bf16.msra.mxu2 %v1047_v34  ;;  %v1267_v53 = vld [vmem:[#allocation5 + $0x134] sm:$0xf0]  ;;  %v1094_v54 = vld [vmem:[#allocation5 + $0x1b0] sm:$0xf]  ;;  %v967_v57 = vor.u32 %v1251_v51, %v966_v49  ;;  %v1233_v60 = vld [vmem:[#allocation5 + $0x24] sm:$0xf0] }
  0x25   :  { %548 = vmatpush.bf16.msra.mxu3 %v1111_v38  ;;  %v1283_v55 = vld [vmem:[#allocation5 + $0x1b4] sm:$0xf0]  ;;  %v1031_v58 = vor.u32 %v1267_v53, %v1030_v52  ;;  %v958_v61 = vld [vmem:[#allocation5 + $0xa0] sm:$0xf]  ;;  %v1249_v63 = vld [vmem:[#allocation5 + $0xa4] sm:$0xf0]  ;;  %v895_v4 = vor.u32 %v1233_v60, %v894_v59 }
  0x26   :  { %510 = vmatpush.bf16.msra.mxu0 %v911_v44  ;;  %v1095_v62 = vor.u32 %v1283_v55, %v1094_v54  ;;  %v1022_v0 = vld [vmem:[#allocation5 + $0x120] sm:$0xf]  ;;  %v1265_v1 = vld [vmem:[#allocation5 + $0x124] sm:$0xf0]  ;;  %v959_v5 = vor.u32 %v1249_v63, %v958_v61  ;;  %v886_v7 = vld [vmem:[#allocation5 + $0x10] sm:$0xf] }
  0x27   :  { %523 = vmatpush.bf16.msra.mxu1 %v975_v45  ;;  %v1086_v2 = vld [vmem:[#allocation5 + $0x1a0] sm:$0xf]  ;;  %v1281_v3 = vld [vmem:[#allocation5 + $0x1a4] sm:$0xf0]  ;;  %v1023_v6 = vor.u32 %v1265_v1, %v1022_v0  ;;  %v1231_v8 = vld [vmem:[#allocation5 + $0x14] sm:$0xf0] }
  0x28   :  { %536 = vmatpush.bf16.msra.mxu2 %v1039_v46  ;;  %v950_v9 = vld [vmem:[#allocation5 + $0x90] sm:$0xf]  ;;  %v1087_v10 = vor.u32 %v1281_v3, %v1086_v2  ;;  %v1247_v11 = vld [vmem:[#allocation5 + $0x94] sm:$0xf0]  ;;  %v887_v16 = vor.u32 %v1231_v8, %v886_v7  ;;  %v878_v17 = vld [vmem:[#allocation5] sm:$0xf] }
  0x29   :  { %549 = vmatpush.bf16.msra.mxu3 %v1103_v50  ;;  %v1014_v12 = vld [vmem:[#allocation5 + $0x110] sm:$0xf]  ;;  %v1263_v13 = vld [vmem:[#allocation5 + $0x114] sm:$0xf0]  ;;  %v1229_v18 = vld [vmem:[#allocation5 + $0x4] sm:$0xf0]  ;;  %v951_v20 = vor.u32 %v1247_v11, %v950_v9 }
  0x2a   :  { %511 = vmatpush.bf16.msra.mxu0 %v903_v56  ;;  %v1078_v14 = vld [vmem:[#allocation5 + $0x190] sm:$0xf]  ;;  %v1279_v15 = vld [vmem:[#allocation5 + $0x194] sm:$0xf0]  ;;  %v942_v19 = vld [vmem:[#allocation5 + $0x80] sm:$0xf]  ;;  %v1015_v21 = vor.u32 %v1263_v13, %v1014_v12  ;;  %v879_v32 = vor.u32 %v1229_v18, %v878_v17 }
  0x2b   :  { %524 = vmatpush.bf16.msra.mxu1 %v967_v57  ;;  %v1245_v22 = vld [vmem:[#allocation5 + $0x84] sm:$0xf0]  ;;  %v1006_v23 = vld [vmem:[#allocation5 + $0x100] sm:$0xf]  ;;  %v1079_v25 = vor.u32 %v1279_v15, %v1078_v14  ;;  %v1242_v28 = vld [vmem:[#allocation5 + $0x74] sm:$0xf] }
  0x2c   :  { %537 = vmatpush.bf16.msra.mxu2 %v1031_v58  ;;  %v1261_v24 = vld [vmem:[#allocation5 + $0x104] sm:$0xf0]  ;;  %v1070_v26 = vld [vmem:[#allocation5 + $0x180] sm:$0xf]  ;;  %v936_v29 = vld [vmem:[#allocation5 + $0x78] sm:$0xf0]  ;;  %v943_v37 = vor.u32 %v1245_v22, %v942_v19 }
  0x2d   :  { %550 = vmatpush.bf16.msra.mxu3 %v1095_v62  ;;  %v1277_v27 = vld [vmem:[#allocation5 + $0x184] sm:$0xf0]  ;;  %v1258_v30 = vld [vmem:[#allocation5 + $0xf4] sm:$0xf]  ;;  %v102_v31 = vld [vmem:[#allocation2 + $0x8] sm:$0xff]  ;;  %v1007_v38 = vor.u32 %v1261_v24, %v1006_v23  ;;  %v939_v43 = vor.u32 %v1242_v28, %v936_v29  ;;  %s1489_s29 = smov [#allocation11]  }
  0x2e   :  { %512 = vmatpush.bf16.msra.mxu0 %v895_v4  ;;  %v1000_v33 = vld [vmem:[#allocation5 + $0xf8] sm:$0xf0]  ;;  %v1274_v34 = vld [vmem:[#allocation5 + $0x174] sm:$0xf]  ;;  %v177_v36 = vunpack.c.l.b16 %v102_v31  ;;  %v178_v41 = vunpack.c.h.b16 %v102_v31  ;;  %v1071_v42 = vor.u32 %v1277_v27, %v1070_v26  ;;  %v1240_v47 = vld [vmem:[#allocation5 + $0x64] sm:$0xf] }
  0x2f   :  { %525 = vmatpush.bf16.msra.mxu1 %v959_v5  ;;  %v1064_v35 = vld [vmem:[#allocation5 + $0x178] sm:$0xf0]  ;;  %v1290_v39 = vld [vmem:[#allocation5 + $0x1f4] sm:$0xf]  ;;  %v1003_v45 = vor.u32 %v1258_v30, %v1000_v33  ;;  %v928_v48 = vld [vmem:[#allocation5 + $0x68] sm:$0xf0] }
  0x30   :  { %538 = vmatpush.bf16.msra.mxu2 %v1023_v6  ;;  %v1128_v40 = vld [vmem:[#allocation5 + $0x1f8] sm:$0xf0]  ;;  %v101_v44 = vld [vmem:[#allocation2] sm:$0xff]  ;;  %v1067_v46 = vor.u32 %v1274_v34, %v1064_v35  ;;  %v1256_v49 = vld [vmem:[#allocation5 + $0xe4] sm:$0xf]  ;;  %v1545_v56 = vpack.c.b16 %v177_v36, %v177_v36  ;;  %v1549_v60 = vpack.c.b16 %v178_v41, %v178_v41  ;;  %v931_v61 = vor.u32 %v1240_v47, %v928_v48  ;;  %s862_s30 = sshll.u32 %s1489_s29, 4  ;;  %s863_s30 = int_to_ptr.vmem [resolvable:$true] %s862_s30 }
  0x31   :  { %551 = vmatpush.bf16.msra.mxu3 %v1087_v10  ;;  %v175_v50 = vunpack.c.l.b16 %v101_v44  ;;  %v176_v51 = vunpack.c.h.b16 %v101_v44  ;;  %v1131_v52 = vor.u32 %v1290_v39, %v1128_v40  ;;  %v992_v53 = vld [vmem:[#allocation5 + $0xe8] sm:$0xf0]  ;;  %v1272_v54 = vld [vmem:[#allocation5 + $0x164] sm:$0xf]  ;;  %v1238_v1 = vld [vmem:[#allocation5 + $0x54] sm:$0xf] }
  0x32   :  { %513 = vmatpush.bf16.msra.mxu0 %v887_v16  ;;  %v1056_v55 = vld [vmem:[#allocation5 + $0x168] sm:$0xf0]  ;;  %v1288_v57 = vld [vmem:[#allocation5 + $0x1e4] sm:$0xf]  ;;  %v995_v63 = vor.u32 %v1256_v49, %v992_v53  ;;  %v920_v2 = vld [vmem:[#allocation5 + $0x58] sm:$0xf0] }
  0x33   :  { %526 = vmatpush.bf16.msra.mxu1 %v951_v20  ;;  %v1120_v58 = vld [vmem:[#allocation5 + $0x1e8] sm:$0xf0]  ;;  %v1547_v59 = vpack.c.b16 %v175_v50, %v175_v50  ;;  %v1551_v62 = vpack.c.b16 %v176_v51, %v176_v51  ;;  %v1059_v0 = vor.u32 %v1272_v54, %v1056_v55  ;;  %v1254_v3 = vld [vmem:[#allocation5 + $0xd4] sm:$0xf]  ;;  %v984_v5 = vld [vmem:[#allocation5 + $0xd8] sm:$0xf0]  ;;  %v923_v10 = vor.u32 %v1238_v1, %v920_v2 }
  0x34   :  { %539 = vmatpush.bf16.msra.mxu2 %v1015_v21  ;;  %v1123_v4 = vor.u32 %v1288_v57, %v1120_v58  ;;  %v1270_v6 = vld [vmem:[#allocation5 + $0x154] sm:$0xf]  ;;  %v1048_v7 = vld [vmem:[#allocation5 + $0x158] sm:$0xf0]  ;;  %v987_v11 = vor.u32 %v1254_v3, %v984_v5  ;;  %v1236_v13 = vld [vmem:[#allocation5 + $0x44] sm:$0xf] }
  0x35   :  { %552 = vmatpush.bf16.msra.mxu3 %v1079_v25  ;;  %v1286_v8 = vld [vmem:[#allocation5 + $0x1d4] sm:$0xf]  ;;  %v1112_v9 = vld [vmem:[#allocation5 + $0x1d8] sm:$0xf0]  ;;  %v1051_v12 = vor.u32 %v1270_v6, %v1048_v7  ;;  %v912_v14 = vld [vmem:[#allocation5 + $0x48] sm:$0xf0] }
  0x36   :  { %514 = vmatpush.bf16.msra.mxu0 %v879_v32  ;;  %v1252_v15 = vld [vmem:[#allocation5 + $0xc4] sm:$0xf]  ;;  %v1115_v16 = vor.u32 %v1286_v8, %v1112_v9  ;;  %v976_v17 = vld [vmem:[#allocation5 + $0xc8] sm:$0xf0]  ;;  %v915_v22 = vor.u32 %v1236_v13, %v912_v14  ;;  %v1234_v25 = vld [vmem:[#allocation5 + $0x34] sm:$0xf] }
  0x37   :  { %527 = vmatpush.bf16.msra.mxu1 %v943_v37  ;;  %v1268_v18 = vld [vmem:[#allocation5 + $0x144] sm:$0xf]  ;;  %v1040_v19 = vld [vmem:[#allocation5 + $0x148] sm:$0xf0]  ;;  %v979_v23 = vor.u32 %v1252_v15, %v976_v17  ;;  %v904_v26 = vld [vmem:[#allocation5 + $0x38] sm:$0xf0] }
  0x38   :  { %540 = vmatpush.bf16.msra.mxu2 %v1007_v38  ;;  %v1284_v20 = vld [vmem:[#allocation5 + $0x1c4] sm:$0xf]  ;;  %v1104_v21 = vld [vmem:[#allocation5 + $0x1c8] sm:$0xf0]  ;;  %v1043_v24 = vor.u32 %v1268_v18, %v1040_v19  ;;  %v1250_v27 = vld [vmem:[#allocation5 + $0xb4] sm:$0xf]  ;;  %v907_v34 = vor.u32 %v1234_v25, %v904_v26 }
  0x39   :  { %553 = vmatpush.bf16.msra.mxu3 %v1071_v42  ;;  %515 = vmatmul.bf16.vlgmr.msra.gmra.mxu0 %v1547_v59  ;;  %v1107_v28 = vor.u32 %v1284_v20, %v1104_v21  ;;  %v968_v29 = vld [vmem:[#allocation5 + $0xb8] sm:$0xf0]  ;;  %v1266_v30 = vld [vmem:[#allocation5 + $0x134] sm:$0xf]  ;;  %v1232_v37 = vld [vmem:[#allocation5 + $0x24] sm:$0xf] }
  0x3a   :  { %559 = vmatpush.bf16.msrb.mxu0 %v939_v43  ;;  %528 = vmatmul.bf16.vlgmr.msra.gmra.mxu1 %v1551_v62  ;;  %v1032_v31 = vld [vmem:[#allocation5 + $0x138] sm:$0xf0]  ;;  %v1282_v32 = vld [vmem:[#allocation5 + $0x1b4] sm:$0xf]  ;;  %v971_v35 = vor.u32 %v1250_v27, %v968_v29  ;;  %v896_v38 = vld [vmem:[#allocation5 + $0x28] sm:$0xf0] }
  0x3b   :  { %572 = vmatpush.bf16.msrb.mxu1 %v1003_v45  ;;  %541 = vmatmul.bf16.vlgmr.msra.gmra.mxu2 %v1545_v56  ;;  %v1096_v33 = vld [vmem:[#allocation5 + $0x1b8] sm:$0xf0]  ;;  %v1035_v36 = vor.u32 %v1266_v30, %v1032_v31  ;;  %v1248_v39 = vld [vmem:[#allocation5 + $0xa4] sm:$0xf]  ;;  %v960_v41 = vld [vmem:[#allocation5 + $0xa8] sm:$0xf0] }
  0x3c   :  { %585 = vmatpush.bf16.msrb.mxu2 %v1067_v46  ;;  %554 = vmatmul.bf16.vlgmr.msra.gmra.mxu3 %v1549_v60  ;;  %v1099_v40 = vor.u32 %v1282_v32, %v1096_v33  ;;  %v1264_v42 = vld [vmem:[#allocation5 + $0x124] sm:$0xf]  ;;  %v1024_v43 = vld [vmem:[#allocation5 + $0x128] sm:$0xf0]  ;;  %v899_v46 = vor.u32 %v1232_v37, %v896_v38  ;;  %v963_v47 = vor.u32 %v1248_v39, %v960_v41  ;;  %v1230_v49 = vld [vmem:[#allocation5 + $0x14] sm:$0xf] }
  0x3d   :  { %598 = vmatpush.bf16.msrb.mxu3 %v1131_v52  ;;  %v1280_v44 = vld [vmem:[#allocation5 + $0x1a4] sm:$0xf]  ;;  %v1088_v45 = vld [vmem:[#allocation5 + $0x1a8] sm:$0xf0]  ;;  %v1027_v48 = vor.u32 %v1264_v42, %v1024_v43  ;;  %v888_v50 = vld [vmem:[#allocation5 + $0x18] sm:$0xf0] }
  0x3e   :  { %560 = vmatpush.bf16.msrb.mxu0 %v931_v61  ;;  %v1246_v51 = vld [vmem:[#allocation5 + $0x94] sm:$0xf]  ;;  %v1091_v52 = vor.u32 %v1280_v44, %v1088_v45  ;;  %v952_v53 = vld [vmem:[#allocation5 + $0x98] sm:$0xf0]  ;;  %v891_v61 = vor.u32 %v1230_v49, %v888_v50  ;;  %v1228_v1 = vld [vmem:[#allocation5 + $0x4] sm:$0xf] }
  0x3f   :  { %573 = vmatpush.bf16.msrb.mxu1 %v995_v63  ;;  %v1262_v54 = vld [vmem:[#allocation5 + $0x114] sm:$0xf]  ;;  %v1016_v55 = vld [vmem:[#allocation5 + $0x118] sm:$0xf0]  ;;  %v955_v63 = vor.u32 %v1246_v51, %v952_v53  ;;  %v880_v2 = vld [vmem:[#allocation5 + $0x8] sm:$0xf0] }
  0x40   :  { %586 = vmatpush.bf16.msrb.mxu2 %v1059_v0  ;;  %v1278_v57 = vld [vmem:[#allocation5 + $0x194] sm:$0xf]  ;;  %v1080_v58 = vld [vmem:[#allocation5 + $0x198] sm:$0xf0]  ;;  %v1019_v0 = vor.u32 %v1262_v54, %v1016_v55  ;;  %v1244_v3 = vld [vmem:[#allocation5 + $0x84] sm:$0xf] }
  0x41   :  { %599 = vmatpush.bf16.msrb.mxu3 %v1123_v4  ;;  %v1083_v4 = vor.u32 %v1278_v57, %v1080_v58  ;;  %v944_v5 = vld [vmem:[#allocation5 + $0x88] sm:$0xf0]  ;;  %v1260_v6 = vld [vmem:[#allocation5 + $0x104] sm:$0xf]  ;;  %v1299_v14 = vld [vmem:[#allocation8 + $0x38] sm:$0xff]  ;;  %s864_s10 = sshll.u32 %s1577_s7, 4  ;;  %s865_s10 = int_to_ptr.hbm [resolvable:$true] %s864_s10 }
  0x42   :  { %561 = vmatpush.bf16.msrb.mxu0 %v923_v10  ;;  %v1008_v7 = vld [vmem:[#allocation5 + $0x108] sm:$0xf0]  ;;  %v1276_v8 = vld [vmem:[#allocation5 + $0x184] sm:$0xf]  ;;  %v883_v10 = vor.u32 %v1228_v1, %v880_v2  ;;  %v1298_v15 = vld [vmem:[#allocation8 + $0x30] sm:$0xff] }
  0x43   :  { %574 = vmatpush.bf16.msrb.mxu1 %v987_v11  ;;  %v1072_v9 = vld [vmem:[#allocation5 + $0x188] sm:$0xf0]  ;;  %v947_v11 = vor.u32 %v1244_v3, %v944_v5  ;;  %v1296_v17 = vld [vmem:[#allocation8 + $0x20] sm:$0xff]  ;;  %v1295_v18 = vld [vmem:[#allocation8 + $0x18] sm:$0xff] }
  0x44   :  { %587 = vmatpush.bf16.msrb.mxu2 %v1051_v12  ;;  %v1011_v12 = vor.u32 %v1260_v6, %v1008_v7  ;;  %v1075_v13 = vor.u32 %v1276_v8, %v1072_v9  ;;  %v1294_v19 = vld [vmem:[#allocation8 + $0x10] sm:$0xff]  ;;  %v1293_v20 = vld [vmem:[#allocation8 + $0x8] sm:$0xff]  ;;  %v1307_v21 = vld [vmem:[#allocation8 + $0x78] sm:$0xff] }
  0x45   :  { %600 = vmatpush.bf16.msrb.mxu3 %v1115_v16  ;;  %v1297_v16 = vld [vmem:[#allocation8 + $0x28] sm:$0xff]  ;;  %v1302_v25 = vld [vmem:[#allocation8 + $0x50] sm:$0xff]  ;;  %v1315_v58 = vld [vmem:[#allocation10 + $0x38] sm:$0xff] }
  0x46   :  { %562 = vmatpush.bf16.msrb.mxu0 %v915_v22  ;;  %v1306_v22 = vld [vmem:[#allocation8 + $0x70] sm:$0xff]  ;;  %v1301_v30 = vld [vmem:[#allocation8 + $0x48] sm:$0xff]  ;;  %v1311_v1 = vld [vmem:[#allocation10 + $0x18] sm:$0xff] }
  0x47   :  { %575 = vmatpush.bf16.msrb.mxu1 %v979_v23  ;;  %v1303_v23 = vld [vmem:[#allocation8 + $0x58] sm:$0xff]  ;;  %v1310_v2 = vld [vmem:[#allocation10 + $0x10] sm:$0xff]  ;;  %v1309_v3 = vld [vmem:[#allocation10 + $0x8] sm:$0xff] }
  0x48   :  { %588 = vmatpush.bf16.msrb.mxu2 %v1043_v24  ;;  %v1308_v5 = vld [vmem:[#allocation10] sm:$0xff]  ;;  %v1326_v7 = vld [vmem:[%s1574_s4] ss:$0 sm:$0xff] }
  0x49   :  { %601 = vmatpush.bf16.msrb.mxu3 %v1107_v28 }
  0x4a   :  { %563 = vmatpush.bf16.msrb.mxu0 %v907_v34 }
  0x4b   :  { %576 = vmatpush.bf16.msrb.mxu1 %v971_v35 }
  0x4c   :  { %589 = vmatpush.bf16.msrb.mxu2 %v1035_v36  ;;  %v1300_v36 = vld [vmem:[#allocation8 + $0x40] sm:$0xff] }
  0x4d   :  { %602 = vmatpush.bf16.msrb.mxu3 %v1099_v40 }
  0x4e   :  { %564 = vmatpush.bf16.msrb.mxu0 %v899_v46 }
  0x4f   :  { %577 = vmatpush.bf16.msrb.mxu1 %v963_v47 }
  0x50   :  { %590 = vmatpush.bf16.msrb.mxu2 %v1027_v48 }
  0x51   :  { %603 = vmatpush.bf16.msrb.mxu3 %v1091_v52 }
  0x52   :  { %565 = vmatpush.bf16.msrb.mxu0 %v891_v61  ;;  %v1314_v61 = vld [vmem:[#allocation10 + $0x30] sm:$0xff] }
  0x53   :  { %578 = vmatpush.bf16.msrb.mxu1 %v955_v63  ;;  %v1313_v63 = vld [vmem:[#allocation10 + $0x28] sm:$0xff] }
  0x54   :  { %591 = vmatpush.bf16.msrb.mxu2 %v1019_v0  ;;  %v1312_v0 = vld [vmem:[#allocation10 + $0x20] sm:$0xff] }
  0x55   :  { %604 = vmatpush.bf16.msrb.mxu3 %v1083_v4 }
  0x56   :  { %566 = vmatpush.bf16.msrb.mxu0 %v883_v10 }
  0x57   :  { %579 = vmatpush.bf16.msrb.mxu1 %v947_v11 }
  0x58   :  { %592 = vmatpush.bf16.msrb.mxu2 %v1011_v12 }
  0x59   :  { %605 = vmatpush.bf16.msrb.mxu3 %v1075_v13  ;;  %567 = vmatmul.bf16.vlgmr.msrb.gmra.mxu0 %v1547_v59  ;;  %v1292_v59 = vld [vmem:[#allocation8] sm:$0xff] }
  0x5a   :  { %747 = vmatpush.bf16.msra.mxu0 %v1299_v14  ;;  %580 = vmatmul.bf16.vlgmr.msrb.gmra.mxu1 %v1551_v62  ;;  %v167_v62 = vld [vmem:[#allocation7] sm:$0x3]  ;;  %v1327_v14 = vld [vmem:[%s1576_s6] ss:$0 sm:$0xff] }
  0x5b   :  { %593 = vmatmul.bf16.vlgmr.msrb.gmra.mxu2 %v1545_v56  ;;  %760 = vmatpush.bf16.msra.mxu1 %v1307_v21  ;;  %v1305_v56 = vld [vmem:[#allocation8 + $0x68] sm:$0xff]  ;;  %v169_v24 = vperm.slane %v167_v62, 0  ;;  %v170_v42 = vperm.slane %v167_v62, 1 }
  0x5c   :  { %606 = vmatmul.bf16.vlgmr.msrb.gmra.mxu3 %v1549_v60  ;;  %v1304_v60 = vld [vmem:[#allocation8 + $0x60] sm:$0xff]  ;;  %843 = vmatpush.bf16.msra.mxu2 %v1315_v58 }
  0x5e   :  { %748 = vmatpush.bf16.msra.mxu0 %v1298_v15 }
  0x5f   :  { %761 = vmatpush.bf16.msra.mxu1 %v1306_v22 }
  0x60   :  { %844 = vmatpush.bf16.msra.mxu2 %v1314_v61 }
  0x62   :  { %749 = vmatpush.bf16.msra.mxu0 %v1297_v16 }
  0x63   :  { %762 = vmatpush.bf16.msra.mxu1 %v1305_v56 }
  0x64   :  { %845 = vmatpush.bf16.msra.mxu2 %v1313_v63 }
  0x66   :  { %750 = vmatpush.bf16.msra.mxu0 %v1296_v17 }
  0x67   :  { %763 = vmatpush.bf16.msra.mxu1 %v1304_v60 }
  0x68   :  { %846 = vmatpush.bf16.msra.mxu2 %v1312_v0 }
  0x6a   :  { %751 = vmatpush.bf16.msra.mxu0 %v1295_v18 }
  0x6b   :  { %764 = vmatpush.bf16.msra.mxu1 %v1303_v23 }
  0x6c   :  { %847 = vmatpush.bf16.msra.mxu2 %v1311_v1 }
  0x6e   :  { %752 = vmatpush.bf16.msra.mxu0 %v1294_v19 }
  0x6f   :  { %765 = vmatpush.bf16.msra.mxu1 %v1302_v25 }
  0x70   :  { %848 = vmatpush.bf16.msra.mxu2 %v1310_v2 }
  0x72   :  { %753 = vmatpush.bf16.msra.mxu0 %v1293_v20 }
  0x73   :  { %766 = vmatpush.bf16.msra.mxu1 %v1301_v30 }
  0x74   :  { %849 = vmatpush.bf16.msra.mxu2 %v1309_v3 }
  0x76   :  { %754 = vmatpush.bf16.msra.mxu0 %v1292_v59 }
  0x77   :  { %767 = vmatpush.bf16.msra.mxu1 %v1300_v36 }
  0x78   :  { %850 = vmatpush.bf16.msra.mxu2 %v1308_v5 }
  0xb6   :  { %v516_v26 = vpop.f32.mrf.mxu0 }
  0xb7   :  { %v517_v27 = vadd.f32 %v516_v26, %v169_v24  ;;  %v529_v28 = vpop.f32.mrf.mxu1 }
  0xb9   :  { %v530_v29 = vadd.f32 %v529_v28, %v517_v27 }
  0xbe   :  { %v542_v31 = vpop.f32.mrf.mxu2  ;;  %v518_v35 = vpop.f32.mrf.mxu0 }
  0xbf   :  { %v543_v32 = vadd.f32 %v542_v31, %v530_v29  ;;  %v555_v33 = vpop.f32.mrf.mxu3  ;;  %v531_v37 = vpop.f32.mrf.mxu1 }
  0xc1   :  { %v556_v34 = vadd.f32 %v555_v33, %v543_v32 }
  0xc3   :  { %v611_v38 = vmax.f32 %v556_v34, 0.0 }
  0xc5   :  { %v613_v39 = vpack.c.bf16 %v611_v38, %v611_v38 }
  0xc6   :  { %v544_v40 = vpop.f32.mrf.mxu2 }
  0xc7   :  { %755 = vmatmul.bf16.vlgmr.msra.gmra.mxu0 %v613_v39  ;;  %v557_v41 = vpop.f32.mrf.mxu3 }
  0xd6   :  { %v568_v43 = vpop.f32.mrf.mxu0 }
  0xd7   :  { %v569_v44 = vadd.f32 %v568_v43, %v170_v42  ;;  %v581_v45 = vpop.f32.mrf.mxu1 }
  0xd9   :  { %v582_v46 = vadd.f32 %v581_v45, %v569_v44 }
  0xde   :  { %v594_v47 = vpop.f32.mrf.mxu2  ;;  %v570_v50 = vpop.f32.mrf.mxu0 }
  0xdf   :  { %v595_v48 = vadd.f32 %v594_v47, %v582_v46  ;;  %v607_v49 = vpop.f32.mrf.mxu3  ;;  %v583_v51 = vpop.f32.mrf.mxu1 }
  0xe1   :  { %v608_v52 = vadd.f32 %v607_v49, %v595_v48 }
  0xe3   :  { %v612_v53 = vmax.f32 %v608_v52, 0.0 }
  0xe5   :  { %v614_v54 = vpack.c.bf16 %v612_v53, %v612_v53 }
  0xe6   :  { %v596_v55 = vpop.f32.mrf.mxu2 }
  0xe7   :  { %v609_v57 = vpop.f32.mrf.mxu3  ;;  %768 = vmatmul.bf16.vlgmr.msra.gmra.mxu1 %v614_v54 }
 0x144   :  { %v756_v4 = vpop.f32.mrf.mxu0 }
 0x145   :  { %v757_v8 = vadd.f32 %v1326_v7, %v756_v4 }
 0x14c   :  { %v758_v6 = vpop.f32.mrf.mxu0 }
 0x164   :  { %v769_v9 = vpop.f32.mrf.mxu1 }
 0x165   :  { %v770_v10 = vadd.f32 %v769_v9, %v757_v8 }
 0x167   :  { %v773_v11 = vmax.f32 %v770_v10, 0.0 }
 0x169   :  { %v774_v12 = vpack.c.bf16 %v773_v11, %v773_v11 }
 0x16b   :  { %851 = vmatmul.bf16.vlgmr.msra.gmra.mxu2 %v774_v12 }
 0x16c   :  { %v771_v13 = vpop.f32.mrf.mxu1 }
 0x1ee   :  { %v852_v15 = vpop.f32.mrf.mxu2 }
 0x1ef   :  { %v853_v16 = vadd.f32 %v1327_v14, %v852_v15 }
 0x1f1   :  { %856 = vst [vmem:[#allocation11] sm:$0xff] %v853_v16 }
 0x1f2   :  { %867 = dma.vmem_to_hbm [thread:$0]  %s863_s30, 128, %s865_s10, [#allocation4]  }
 0x1f6   :  { %v854_v17 = vpop.f32.mrf.mxu2 }
 0x1f7   :  { %1478 = dma.done.wait [#allocation4], 128  }
 0x1f8   :  { %1479 = vsyncadd [#allocation4], 4294967168 }
 0x1f9   :  { %872 = vsyncpa [#allocation3], 1 }
 0x1fa   :  { %873 = vsyncpa [#allocation6], 1 }
 0x1fb   :  { %874 = vsyncpa [#allocation9], 1 }
 0x1fc   :  { %875 = vsyncpa [#allocation4], 1 }

</bundles_post_ra>
